<compile_context>
chip_gen: v7x
topology: tpu7x:2x2x1
jax: 0.10.0
libtpu: 0.0.40
codegen_flags: <defaults>
</compile_context>

<pallas_src>
import numpy as np
import jax
import jax.numpy as jnp
from jax.experimental import pallas as pl
from jax.experimental.pallas import tpu as pltpu


_LANE = 128               # TPU lane width (last-dim tiling unit)
_MAX_INFLIGHT_DMAS = 4    # chunk DMAs issued before waiting (review: 2-4 in flight)


def _sublane_pack(dtype):
    """Rows per (8,128) 32-bit tile for this dtype (f32:8, bf16:16, int8:32)."""
    return {4: 8, 2: 16, 1: 32}.get(jnp.dtype(dtype).itemsize, 8)


def _reslab_shape(n_elems):
    """Lane-dense 2-D slab shape for an n_elems-element contiguous copy.

    If the total is a multiple of 128 we use (N/128, 128): every row is a full
    lane group, so each row-chunk DMA covers whole (sublane, lane) tiles and is
    a contiguous HBM burst.  Odd totals fall back to a single-row slab copied
    with one full-array DMA (still correct, just a tiny tensor anyway).
    """
    if n_elems % _LANE == 0:
        return (n_elems // _LANE, _LANE)
    return (1, n_elems)


def _chunk_row_bounds(num_rows, max_chunks, align):
    """Static (start, size) row ranges covering [0, num_rows).

    At most `max_chunks` pieces; interior boundaries are rounded to multiples
    of `align` (the sublane pack) when there is room, so each chunk DMA stays
    tile-aligned.  Pure host-side arithmetic (no O(dim) loops).
    """
    n = max(1, min(max_chunks, num_rows))
    cuts = [0]
    for i in range(1, n):
        c = (i * num_rows) // n
        if align > 1 and num_rows >= n * align:
            c = (c // align) * align
        c = max(cuts[-1] + 1, min(c, num_rows - (n - i)))
        cuts.append(c)
    cuts.append(num_rows)
    return [(lo, hi - lo) for lo, hi in zip(cuts[:-1], cuts[1:]) if hi > lo]


def _make_hbm_copy_kernel(bounds):
    """Kernel: chunked HBM->HBM DMA copy.

    `bounds` is a static list of (row_start, row_count).  All chunk DMAs are
    started back-to-back (up to _MAX_INFLIGHT_DMAS in flight), then waited.
    No TensorCore compute, no VMEM staging: the DMA engines stream the bytes
    at the HBM roofline.
    """
    def kernel(x_hbm, o_hbm, sems):
        copies = []
        for c, (lo, sz) in enumerate(bounds):
            cp = pltpu.make_async_copy(
                x_hbm.at[pl.ds(lo, sz)],
                o_hbm.at[pl.ds(lo, sz)],
                sems.at[c])
            cp.start()
            copies.append(cp)
        for cp in copies:
            cp.wait()
    return kernel


def _materializing_copy(slab):
    """Contiguous HBM->HBM copy of a 2-D slab via chunked async DMA."""
    rows, cols = slab.shape
    itemsize = jnp.dtype(slab.dtype).itemsize
    bounds = _chunk_row_bounds(rows, _MAX_INFLIGHT_DMAS, _sublane_pack(slab.dtype))

    return pl.pallas_call(
        _make_hbm_copy_kernel(bounds),
        out_shape=jax.ShapeDtypeStruct((rows, cols), slab.dtype),
        # Both operands stay in HBM; the kernel DMAs between them directly.
        in_specs=[pl.BlockSpec(memory_space=pl.ANY)],
        out_specs=pl.BlockSpec(memory_space=pl.ANY),
        scratch_shapes=[pltpu.SemaphoreType.DMA((len(bounds),))],
        # Memory-bound copy: 0 flops, read + write of the whole tensor.
        cost_estimate=pl.CostEstimate(
            flops=0,
            transcendentals=0,
            bytes_accessed=2 * rows * cols * itemsize),
    )(slab)


def view_forward(x, shape, *, materialize=False):
    """JAX/Pallas equivalent of View(shape).forward(x).

    Default path is metadata-only (no Pallas call, no HBM traffic), matching
    torch.Tensor.view semantics.  Set materialize=True to produce an
    independent contiguous copy via the HBM->HBM DMA kernel.
    """
    batch = x.shape[0]
    flat = int(np.prod(x.shape[1:], dtype=np.int64)) if x.ndim > 1 else 1

    # Resolve a possible -1 in `shape` (torch .view semantics).
    shape = tuple(int(s) for s in shape)
    if -1 in shape:
        known = int(np.prod([s for s in shape if s != -1], dtype=np.int64))
        shape = tuple(flat // known if s == -1 else s for s in shape)
    assert int(np.prod(shape, dtype=np.int64)) == flat, \
        "View shape incompatible with input"
    out_shape = (batch,) + shape

    if not materialize:
        # A view is free: reshape is metadata-only inside XLA.
        return x.reshape(out_shape)

    # Re-slab to a lane-dense layout independent of the batch dim (metadata
    # only), copy HBM->HBM, then reshape back (metadata only).
    n = batch * flat
    slab = x.reshape(_reslab_shape(n))
    out = _materializing_copy(slab)
    return out.reshape(out_shape)


if __name__ == "__main__":
    k0, k1 = jax.random.split(jax.random.PRNGKey(0))

    # (1) Spec-sized input: NCHW batch=2, channels=4, spatial=16x16,
    #     View((1024,)) flattening C*H*W.  Slab = (16, 128), multi-chunk DMA.
    x = jax.random.normal(k0, (2, 4, 16, 16), dtype=jnp.float32)
    ref = np.asarray(x).reshape(2, 1024)

    out_view = view_forward(x, (1024,))                      # free metadata path
    out_copy = view_forward(x, (1024,), materialize=True)    # Pallas DMA copy
    out_view, out_copy = jax.block_until_ready((out_view, out_copy))

    assert out_view.shape == (2, 1024) and out_view.dtype == x.dtype
    assert out_copy.shape == (2, 1024) and out_copy.dtype == x.dtype
    np.testing.assert_array_equal(np.asarray(out_view), ref)
    np.testing.assert_array_equal(np.asarray(out_copy), ref)

    # (2) Multi-chunk exercise with -1 in the view shape: batch=16 -> 16384
    #     elements -> slab (128, 128) -> 4 concurrent 32-row chunk DMAs.
    x2 = jax.random.normal(k1, (16, 4, 16, 16), dtype=jnp.float32)
    ref2 = np.asarray(x2).reshape(16, 4, 256)
    out2 = view_forward(x2, (4, -1), materialize=True)
    out2 = jax.block_until_ready(out2)
    assert out2.shape == (16, 4, 256)
    np.testing.assert_array_equal(np.asarray(out2), ref2)

    # (3) Odd, non-128-divisible total (2*3*5*7 = 210 elements): falls back to
    #     a single full-slab DMA.
    x3 = jax.random.normal(k0, (2, 3, 5, 7), dtype=jnp.float32)
    out3 = view_forward(x3, (-1,), materialize=True)
    out3 = jax.block_until_ready(out3)
    np.testing.assert_array_equal(np.asarray(out3), np.asarray(x3).reshape(2, 105))

    print("KERNEL_OK")
</pallas_src>

<mosaic_0001>
module attributes {stable_mosaic.version = 11 : i64} {
  func.func @kernel(%arg0: memref<16x128xf32, #tpu.memory_space<any>>, %arg1: memref<16x128xf32, #tpu.memory_space<any>>, %arg2: memref<4x!tpu.dma_semaphore, #tpu.memory_space<semaphore_mem>>) attributes {dimension_semantics = [], scalar_prefetch = 0 : i64, scratch_operands = 1 : i64, tpu.core_type = #tpu.core_type<tc>} {
    %c0_i32 = arith.constant 0 : i32
    %c0_i32_0 = arith.constant 0 : i32
    %c0_i32_1 = arith.constant 0 : i32
    %0 = tpu.memref_slice %arg0[%c0_i32_0, %c0_i32_1] : memref<16x128xf32, #tpu.memory_space<any>> -> memref<4x128xf32, #tpu.memory_space<any>>
    %c0_i32_2 = arith.constant 0 : i32
    %c0_i32_3 = arith.constant 0 : i32
    %1 = tpu.memref_slice %arg1[%c0_i32_2, %c0_i32_3] : memref<16x128xf32, #tpu.memory_space<any>> -> memref<4x128xf32, #tpu.memory_space<any>>
    %2 = tpu.memref_slice %arg2[%c0_i32] : memref<4x!tpu.dma_semaphore, #tpu.memory_space<semaphore_mem>> -> memref<1x!tpu.dma_semaphore, #tpu.memory_space<semaphore_mem>>
    %3 = tpu.memref_squeeze %2 : memref<1x!tpu.dma_semaphore, #tpu.memory_space<semaphore_mem>> -> memref<!tpu.dma_semaphore, #tpu.memory_space<semaphore_mem>>
    tpu.enqueue_dma source(%0 : memref<4x128xf32, #tpu.memory_space<any>>) target(%1 : memref<4x128xf32, #tpu.memory_space<any>>) target_semaphore(%3 : memref<!tpu.dma_semaphore, #tpu.memory_space<semaphore_mem>>)
    %c1_i32 = arith.constant 1 : i32
    %c4_i32 = arith.constant 4 : i32
    %c0_i32_4 = arith.constant 0 : i32
    %4 = tpu.memref_slice %arg0[%c4_i32, %c0_i32_4] : memref<16x128xf32, #tpu.memory_space<any>> -> memref<4x128xf32, #tpu.memory_space<any>>
    %c4_i32_5 = arith.constant 4 : i32
    %c0_i32_6 = arith.constant 0 : i32
    %5 = tpu.memref_slice %arg1[%c4_i32_5, %c0_i32_6] : memref<16x128xf32, #tpu.memory_space<any>> -> memref<4x128xf32, #tpu.memory_space<any>>
    %6 = tpu.memref_slice %arg2[%c1_i32] : memref<4x!tpu.dma_semaphore, #tpu.memory_space<semaphore_mem>> -> memref<1x!tpu.dma_semaphore, #tpu.memory_space<semaphore_mem>>
    %7 = tpu.memref_squeeze %6 : memref<1x!tpu.dma_semaphore, #tpu.memory_space<semaphore_mem>> -> memref<!tpu.dma_semaphore, #tpu.memory_space<semaphore_mem>>
    tpu.enqueue_dma source(%4 : memref<4x128xf32, #tpu.memory_space<any>>) target(%5 : memref<4x128xf32, #tpu.memory_space<any>>) target_semaphore(%7 : memref<!tpu.dma_semaphore, #tpu.memory_space<semaphore_mem>>)
    %c2_i32 = arith.constant 2 : i32
    %c8_i32 = arith.constant 8 : i32
    %c0_i32_7 = arith.constant 0 : i32
    %8 = tpu.memref_slice %arg0[%c8_i32, %c0_i32_7] : memref<16x128xf32, #tpu.memory_space<any>> -> memref<4x128xf32, #tpu.memory_space<any>>
    %c8_i32_8 = arith.constant 8 : i32
    %c0_i32_9 = arith.constant 0 : i32
    %9 = tpu.memref_slice %arg1[%c8_i32_8, %c0_i32_9] : memref<16x128xf32, #tpu.memory_space<any>> -> memref<4x128xf32, #tpu.memory_space<any>>
    %10 = tpu.memref_slice %arg2[%c2_i32] : memref<4x!tpu.dma_semaphore, #tpu.memory_space<semaphore_mem>> -> memref<1x!tpu.dma_semaphore, #tpu.memory_space<semaphore_mem>>
    %11 = tpu.memref_squeeze %10 : memref<1x!tpu.dma_semaphore, #tpu.memory_space<semaphore_mem>> -> memref<!tpu.dma_semaphore, #tpu.memory_space<semaphore_mem>>
    tpu.enqueue_dma source(%8 : memref<4x128xf32, #tpu.memory_space<any>>) target(%9 : memref<4x128xf32, #tpu.memory_space<any>>) target_semaphore(%11 : memref<!tpu.dma_semaphore, #tpu.memory_space<semaphore_mem>>)
    %c3_i32 = arith.constant 3 : i32
    %c12_i32 = arith.constant 12 : i32
    %c0_i32_10 = arith.constant 0 : i32
    %12 = tpu.memref_slice %arg0[%c12_i32, %c0_i32_10] : memref<16x128xf32, #tpu.memory_space<any>> -> memref<4x128xf32, #tpu.memory_space<any>>
    %c12_i32_11 = arith.constant 12 : i32
    %c0_i32_12 = arith.constant 0 : i32
    %13 = tpu.memref_slice %arg1[%c12_i32_11, %c0_i32_12] : memref<16x128xf32, #tpu.memory_space<any>> -> memref<4x128xf32, #tpu.memory_space<any>>
    %14 = tpu.memref_slice %arg2[%c3_i32] : memref<4x!tpu.dma_semaphore, #tpu.memory_space<semaphore_mem>> -> memref<1x!tpu.dma_semaphore, #tpu.memory_space<semaphore_mem>>
    %15 = tpu.memref_squeeze %14 : memref<1x!tpu.dma_semaphore, #tpu.memory_space<semaphore_mem>> -> memref<!tpu.dma_semaphore, #tpu.memory_space<semaphore_mem>>
    tpu.enqueue_dma source(%12 : memref<4x128xf32, #tpu.memory_space<any>>) target(%13 : memref<4x128xf32, #tpu.memory_space<any>>) target_semaphore(%15 : memref<!tpu.dma_semaphore, #tpu.memory_space<semaphore_mem>>)
    %c0_i32_13 = arith.constant 0 : i32
    %c0_i32_14 = arith.constant 0 : i32
    %c0_i32_15 = arith.constant 0 : i32
    %16 = tpu.memref_slice %arg0[%c0_i32_14, %c0_i32_15] : memref<16x128xf32, #tpu.memory_space<any>> -> memref<4x128xf32, #tpu.memory_space<any>>
    %c0_i32_16 = arith.constant 0 : i32
    %c0_i32_17 = arith.constant 0 : i32
    %17 = tpu.memref_slice %arg1[%c0_i32_16, %c0_i32_17] : memref<16x128xf32, #tpu.memory_space<any>> -> memref<4x128xf32, #tpu.memory_space<any>>
    %18 = tpu.memref_slice %arg2[%c0_i32_13] : memref<4x!tpu.dma_semaphore, #tpu.memory_space<semaphore_mem>> -> memref<1x!tpu.dma_semaphore, #tpu.memory_space<semaphore_mem>>
    %19 = tpu.memref_squeeze %18 : memref<1x!tpu.dma_semaphore, #tpu.memory_space<semaphore_mem>> -> memref<!tpu.dma_semaphore, #tpu.memory_space<semaphore_mem>>
    tpu.wait_dma2 semaphore(%19 : memref<!tpu.dma_semaphore, #tpu.memory_space<semaphore_mem>>) src(%16 : memref<4x128xf32, #tpu.memory_space<any>>) dst(%17 : memref<4x128xf32, #tpu.memory_space<any>>)
    %c1_i32_18 = arith.constant 1 : i32
    %c4_i32_19 = arith.constant 4 : i32
    %c0_i32_20 = arith.constant 0 : i32
    %20 = tpu.memref_slice %arg0[%c4_i32_19, %c0_i32_20] : memref<16x128xf32, #tpu.memory_space<any>> -> memref<4x128xf32, #tpu.memory_space<any>>
    %c4_i32_21 = arith.constant 4 : i32
    %c0_i32_22 = arith.constant 0 : i32
    %21 = tpu.memref_slice %arg1[%c4_i32_21, %c0_i32_22] : memref<16x128xf32, #tpu.memory_space<any>> -> memref<4x128xf32, #tpu.memory_space<any>>
    %22 = tpu.memref_slice %arg2[%c1_i32_18] : memref<4x!tpu.dma_semaphore, #tpu.memory_space<semaphore_mem>> -> memref<1x!tpu.dma_semaphore, #tpu.memory_space<semaphore_mem>>
    %23 = tpu.memref_squeeze %22 : memref<1x!tpu.dma_semaphore, #tpu.memory_space<semaphore_mem>> -> memref<!tpu.dma_semaphore, #tpu.memory_space<semaphore_mem>>
    tpu.wait_dma2 semaphore(%23 : memref<!tpu.dma_semaphore, #tpu.memory_space<semaphore_mem>>) src(%20 : memref<4x128xf32, #tpu.memory_space<any>>) dst(%21 : memref<4x128xf32, #tpu.memory_space<any>>)
    %c2_i32_23 = arith.constant 2 : i32
    %c8_i32_24 = arith.constant 8 : i32
    %c0_i32_25 = arith.constant 0 : i32
    %24 = tpu.memref_slice %arg0[%c8_i32_24, %c0_i32_25] : memref<16x128xf32, #tpu.memory_space<any>> -> memref<4x128xf32, #tpu.memory_space<any>>
    %c8_i32_26 = arith.constant 8 : i32
    %c0_i32_27 = arith.constant 0 : i32
    %25 = tpu.memref_slice %arg1[%c8_i32_26, %c0_i32_27] : memref<16x128xf32, #tpu.memory_space<any>> -> memref<4x128xf32, #tpu.memory_space<any>>
    %26 = tpu.memref_slice %arg2[%c2_i32_23] : memref<4x!tpu.dma_semaphore, #tpu.memory_space<semaphore_mem>> -> memref<1x!tpu.dma_semaphore, #tpu.memory_space<semaphore_mem>>
    %27 = tpu.memref_squeeze %26 : memref<1x!tpu.dma_semaphore, #tpu.memory_space<semaphore_mem>> -> memref<!tpu.dma_semaphore, #tpu.memory_space<semaphore_mem>>
    tpu.wait_dma2 semaphore(%27 : memref<!tpu.dma_semaphore, #tpu.memory_space<semaphore_mem>>) src(%24 : memref<4x128xf32, #tpu.memory_space<any>>) dst(%25 : memref<4x128xf32, #tpu.memory_space<any>>)
    %c3_i32_28 = arith.constant 3 : i32
    %c12_i32_29 = arith.constant 12 : i32
    %c0_i32_30 = arith.constant 0 : i32
    %28 = tpu.memref_slice %arg0[%c12_i32_29, %c0_i32_30] : memref<16x128xf32, #tpu.memory_space<any>> -> memref<4x128xf32, #tpu.memory_space<any>>
    %c12_i32_31 = arith.constant 12 : i32
    %c0_i32_32 = arith.constant 0 : i32
    %29 = tpu.memref_slice %arg1[%c12_i32_31, %c0_i32_32] : memref<16x128xf32, #tpu.memory_space<any>> -> memref<4x128xf32, #tpu.memory_space<any>>
    %30 = tpu.memref_slice %arg2[%c3_i32_28] : memref<4x!tpu.dma_semaphore, #tpu.memory_space<semaphore_mem>> -> memref<1x!tpu.dma_semaphore, #tpu.memory_space<semaphore_mem>>
    %31 = tpu.memref_squeeze %30 : memref<1x!tpu.dma_semaphore, #tpu.memory_space<semaphore_mem>> -> memref<!tpu.dma_semaphore, #tpu.memory_space<semaphore_mem>>
    tpu.wait_dma2 semaphore(%31 : memref<!tpu.dma_semaphore, #tpu.memory_space<semaphore_mem>>) src(%28 : memref<4x128xf32, #tpu.memory_space<any>>) dst(%29 : memref<4x128xf32, #tpu.memory_space<any>>)
    return
  }
}

</mosaic_0001>

<bundles_post_ra>
// kernel: tpu_custom_call.1
= control target key start
LH: loop header
LB: loop body
LE: loop exit
PB: predicated region body
PF: predicated region fallthrough
CT: control target
= control target key end

     0   :  { %s124_s9 = smov [#allocation2]   ;;  %s125_s10 = smov [#allocation3]   ;;  %s167_s0 = inlined_call_operand.hbm [shape: f32[16,128], index: 0, kind: input, shape index: {}]   ;;  %s168_s1 = inlined_call_operand.hbm [shape: f32[16,128], index: 1, kind: output, shape index: {}]  }
   0x1   :  { %s19_s8 = scalar_lea.hbm %s167_s0, 64  ;;  %s126_s11 = smov 0  }
   0x2   :  { %18 = dma.general %s167_s0, 64, %s168_s1, %s124_s9, %s125_s10, [#allocation4], %s126_s11, 0  }
   0x3   :  { %s20_s18 = scalar_lea.hbm %s168_s1, 64  ;;  %s35_s21 = scalar_lea.hbm %s167_s0, 128 }
   0x4   :  { %s127_s22 = smov [#allocation2 + $0x1]   ;;  %s128_s23 = smov [#allocation5]  }
   0x5   :  { %34 = dma.general %s19_s8, 64, %s20_s18, %s127_s22, %s128_s23, [#allocation6], %s126_s11, 0  }
   0x6   :  { %s36_s26 = scalar_lea.hbm %s168_s1, 128  ;;  %s51_s29 = scalar_lea.hbm %s167_s0, 192 }
   0x7   :  { %s129_s30 = smov [#allocation2 + $0x2]   ;;  %s130_s2 = smov [#allocation7]  }
   0x8   :  { %50 = dma.general %s35_s21, 64, %s36_s26, %s129_s30, %s130_s2, [#allocation8], %s126_s11, 0  }
   0x9   :  { %s52_s5 = scalar_lea.hbm %s168_s1, 192  ;;  %s131_s6 = smov [#allocation2 + $0x3]  }
   0xa   :  { %s132_s7 = smov [#allocation9]  }
   0xb   :  { %66 = dma.general %s51_s29, 64, %s52_s5, %s131_s6, %s132_s7, [#allocation10], %s126_s11, 0  }
   0xc   :  { %116 = dma.done.wait [#allocation2], 64 }
   0xd   :  { %117 = vsyncadd [#allocation2], 4294967232 }
   0xe   :  { %118 = dma.done.wait [#allocation2 + $0x1], 64 }
   0xf   :  { %119 = vsyncadd [#allocation2 + $0x1], 4294967232 }
  0x10   :  { %120 = dma.done.wait [#allocation2 + $0x2], 64 }
  0x11   :  { %121 = vsyncadd [#allocation2 + $0x2], 4294967232 }
  0x12   :  { %122 = dma.done.wait [#allocation2 + $0x3], 64 }
  0x13   :  { %123 = vsyncadd [#allocation2 + $0x3], 4294967232 }
  0x14   :  { %76 = vsyncmov [#allocation2] }
  0x17   :  { %s77_s0 = vpop.sfrf %76 }
  0x18   :  { %p103_p0 = scmp.ne.s32.totalorder %s77_s0, 0 }
  0x1a   :  { %81 = shalt.err (%p103_p0)  }
  0x1b   :  { %83 = vsyncmov [#allocation2 + $0x1] }
  0x1e   :  { %s84_s8 = vpop.sfrf %83 }
  0x1f   :  { %p104_p1 = scmp.ne.s32.totalorder %s84_s8, 0 }
  0x21   :  { %88 = shalt.err (%p104_p1)  }
  0x22   :  { %90 = vsyncmov [#allocation2 + $0x2] }
  0x25   :  { %s91_s1 = vpop.sfrf %90 }
  0x26   :  { %p105_p2 = scmp.ne.s32.totalorder %s91_s1, 0 }
  0x28   :  { %95 = shalt.err (%p105_p2)  }
  0x29   :  { %97 = vsyncmov [#allocation2 + $0x3] }
  0x2c   :  { %s98_s9 = vpop.sfrf %97 }
  0x2d   :  { %p106_p3 = scmp.ne.s32.totalorder %s98_s9, 0 }
  0x2f   :  { %102 = shalt.err (%p106_p3)  }

</bundles_post_ra>
